<compile_context>
chip_gen: v7x
topology: tpu7x:2x2x1
jax: 0.10.0
libtpu: 0.0.40
codegen_flags: <defaults>
</compile_context>

<pallas_src>
import functools

import jax
import jax.numpy as jnp
from jax.experimental import pallas as pl
from jax.experimental.pallas import tpu as pltpu


def _linear_nobias_kernel(x_ref, wt_ref, o_ref):
    # x_ref : (B_pad, input_dim)   full block, resident across the grid
    # wt_ref: (input_dim, tn)      lane-dense tile of the transposed weight
    # o_ref : (B_pad, tn)          corresponding lane-dense output tile
    o_ref[...] = jnp.dot(
        x_ref[...], wt_ref[...], preferred_element_type=jnp.float32
    ).astype(o_ref.dtype)


@functools.partial(jax.jit, static_argnames=("output_ch", "resolution", "tn_max"))
def mlp_one_hot_forward(x, weight, *, output_ch, resolution, tn_max=8192):
    """Pallas forward for MLP_one_hot.

    x:      (B, input_dim)            float32
    weight: (output_dim, input_dim)   float32, exactly torch fc1.weight layout
    returns (B, output_ch, resolution, resolution)
    """
    B, input_dim = x.shape
    output_dim, k_dim = weight.shape
    assert k_dim == input_dim
    assert output_dim == output_ch * resolution * resolution

    # Match PyTorch: x = x.to(fc1.weight.dtype)
    x = x.astype(weight.dtype)

    # Lane-dense transposed weight layout (one-time wrapper-side relayout):
    # (input_dim, output_dim) -> rows of tn*4 B contiguous, K only pads
    # 50 -> 56 sublanes instead of 50 -> 128 lanes.
    w_t = weight.T  # (input_dim, output_dim)

    # Pad batch to a full sublane multiple so output stores are unmasked.
    B_pad = max(8, ((B + 7) // 8) * 8)
    if B_pad != B:
        x = jnp.pad(x, ((0, B_pad - B), (0, 0)))

    # Tile the output/weight N axis. Tiny problems collapse to a single block
    # (no per-grid-step overhead); large problems stream MB-scale tiles.
    if output_dim <= tn_max:
        tn = output_dim          # full dim -> always a legal block shape
    else:
        tn = tn_max              # multiple of 128; last partial block is masked
    grid_n = pl.cdiv(output_dim, tn)

    cost = pl.CostEstimate(
        flops=2 * B_pad * input_dim * output_dim,
        transcendentals=0,
        bytes_accessed=(w_t.size + x.size + B_pad * output_dim) * 4,
    )

    out = pl.pallas_call(
        _linear_nobias_kernel,
        out_shape=jax.ShapeDtypeStruct((B_pad, output_dim), weight.dtype),
        grid_spec=pltpu.PrefetchScalarGridSpec(
            num_scalar_prefetch=0,
            grid=(grid_n,),
            in_specs=[
                # x: full (tiny) block, same for every grid step.
                pl.BlockSpec((B_pad, input_dim), lambda j: (0, 0)),
                # transposed weight: lane-dense (input_dim, tn) tiles along N.
                pl.BlockSpec((input_dim, tn), lambda j: (0, j)),
            ],
            out_specs=pl.BlockSpec((B_pad, tn), lambda j: (0, j)),
        ),
        compiler_params=pltpu.CompilerParams(
            # Output-tile axis is independent; on v7x this also allows the
            # compiler to shard the weight stream across both TensorCores.
            dimension_semantics=("parallel",),
        ),
        cost_estimate=cost,
    )(x, w_t)

    out = out[:B]
    # NCHW view, exactly like PyTorch's .view(B, C, H, W) (pure reshape).
    return out.reshape(B, output_ch, resolution, resolution)


if __name__ == "__main__":
    # Small shapes consistent with the module: one-hot input_dim=50,
    # output_ch=64, resolution=2 -> output_dim=256, batch=4.
    B = 4
    input_dim = 50
    output_ch = 64
    resolution = 2
    output_dim = output_ch * resolution * resolution

    key = jax.random.PRNGKey(0)
    kx, kw = jax.random.split(key)
    x = jax.random.normal(kx, (B, input_dim), dtype=jnp.float32)
    # Deterministic "fc1.weight" of shape (output_dim, input_dim), no bias.
    weight = (
        jax.random.normal(kw, (output_dim, input_dim), dtype=jnp.float32) * 0.02
    )

    y = mlp_one_hot_forward(
        x, weight, output_ch=output_ch, resolution=resolution
    )
    y = jax.block_until_ready(y)

    # Sanity check against plain-JAX reference of the same math.
    ref = (x @ weight.T).reshape(B, output_ch, resolution, resolution)
    assert y.shape == (B, output_ch, resolution, resolution)
    assert jnp.allclose(y, ref, atol=1e-4, rtol=1e-4)

    print("KERNEL_OK")
</pallas_src>

<mosaic_0001>
module attributes {stable_mosaic.version = 11 : i64} {
  func.func @_linear_nobias_kernel(%arg0: i32, %arg1: memref<8x50xf32, #tpu.memory_space<vmem>>, %arg2: memref<50x256xf32, #tpu.memory_space<vmem>>, %arg3: memref<8x256xf32, #tpu.memory_space<vmem>>) attributes {dimension_semantics = [#tpu.dimension_semantics<parallel>], iteration_bounds = array<i64: 1>, scalar_prefetch = 0 : i64, scratch_operands = 0 : i64, tpu.core_type = #tpu.core_type<tc>, window_params = [{pipeline_mode = #tpu.pipeline_mode<synchronous>, transform_indices = @transform_0, window_bounds = array<i64: 8, 50>}, {transform_indices = @transform_1, window_bounds = array<i64: 50, 256>}, {transform_indices = @transform_2, window_bounds = array<i64: 8, 256>}]} {
    %c0 = arith.constant 0 : index
    %c0_0 = arith.constant 0 : index
    %0 = vector.load %arg1[%c0, %c0_0] : memref<8x50xf32, #tpu.memory_space<vmem>>, vector<8x50xf32>
    %c0_1 = arith.constant 0 : index
    %c0_2 = arith.constant 0 : index
    %1 = vector.load %arg2[%c0_1, %c0_2] : memref<50x256xf32, #tpu.memory_space<vmem>>, vector<50x256xf32>
    %cst = arith.constant dense<0.000000e+00> : vector<8x256xf32>
    %2 = tpu.matmul %0, %1, %cst {dimension_numbers = #tpu.dot_dimension_numbers<[1], [0], [0], [1], [0, 0, 1, 1], [], []>} : vector<8x50xf32>, vector<50x256xf32>, vector<8x256xf32> -> vector<8x256xf32>
    %c0_3 = arith.constant 0 : index
    %c0_4 = arith.constant 0 : index
    %3 = vector.load %arg3[%c0_3, %c0_4] : memref<8x256xf32, #tpu.memory_space<vmem>>, vector<8x256xf32>
    tpu.vector_store %arg3[%c0_3, %c0_4], %2 {strides = array<i32>} : memref<8x256xf32, #tpu.memory_space<vmem>>, vector<8x256xf32>,
    return
  }
  func.func @transform_0(%arg0: i32) -> (i32, i32) {
    %c0_i32 = arith.constant 0 : i32
    %c0_i32_0 = arith.constant 0 : i32
    %c0_i32_1 = arith.constant 0 : i32
    return %c0_i32, %c0_i32_0 : i32, i32
  }
  func.func @transform_1(%arg0: i32) -> (i32, i32) {
    %c0_i32 = arith.constant 0 : i32
    %c0_i32_0 = arith.constant 0 : i32
    return %c0_i32, %arg0 : i32, i32
  }
  func.func @transform_2(%arg0: i32) -> (i32, i32) {
    %c0_i32 = arith.constant 0 : i32
    %c0_i32_0 = arith.constant 0 : i32
    return %c0_i32, %arg0 : i32, i32
  }
}

</mosaic_0001>

<bundles_post_ra>
// kernel: mlp_one_hot_forward.1
= control target key start
LH: loop header
LB: loop body
LE: loop exit
PB: predicated region body
PF: predicated region fallthrough
CT: control target
= control target key end

     0   :  { %7 = vsyncpa [#allocation3], 0  ;;  %s172_s9 = smov [#allocation2]   ;;  %s212_s0 = inlined_call_operand.vmem [shape: f32[8,50], index: 0, kind: input, shape index: {}]   ;;  %s213_s1 = inlined_call_operand.hbm [shape: f32[50,256], index: 1, kind: input, shape index: {}]   ;;  %s214_s2 = inlined_call_operand.vmem [shape: f32[8,256], index: 2, kind: output, shape index: {}]  }
   0x1   :  { %s15_s10 = sshll.u32 %s172_s9, 4  ;;  %s148_s13 = scalar_lea.hbm %s213_s1, 1792  ;;  %s16_s10 = int_to_ptr.vmem [resolvable:$true] %s15_s10 }
   0x2   :  { %p149_p0 = scmp.ne.s32.totalorder %s213_s1, %s148_s13  ;;  %p152_p1 = scmp.lt.u32.totalorder %s148_s13, %s213_s1 }
   0x4   :  { %p154_p2 = pnand %p152_p1, %p149_p0 }
   0x6   :  { %157 = shalt.err (!%p154_p2)
}
   0x7   :  { %s158_s18 = scalar_lea.vmem %s16_s10, 1792  ;;  %p163_p4 = scmp.lt.s32.totalorder %s16_s10, %s16_s10 }
   0x8   :  { %p159_p3 = scmp.ne.s32.totalorder %s16_s10, %s158_s18  ;;  %p164_p5 = scmp.lt.s32.totalorder %s158_s18, %s158_s18 }
   0xa   :  { %p165_p6 = por %p164_p5, %p163_p4 }
   0xc   :  { %p166_p7 = pnand %p165_p6, %p159_p3 }
   0xe   :  { %169 = shalt.err (!%p166_p7)
}
   0xf   :  { %s173_s19 = smov 256   ;;  %s174_s20 = smov 16  }
  0x10   :  { %21 = dma.hbm_to_vmem [thread:$0]  %s213_s1, 1792, %s16_s10, [#allocation3], %s173_s19, %s173_s19, %s174_s20  }
  0x11   :  { %170 = dma.done.wait [#allocation3], 1792  }
  0x12   :  { %171 = vsyncadd [#allocation3], 4294965504  ;;  %v175_v0 = vmov 0.0   ;;  %v27_v1 = vld [vmem:[#allocation2 + $0x8] sm:$0xff]  ;;  %v29_v2 = vld [vmem:[#allocation2 + $0x18] sm:$0xff]  ;;  %vm44_vm0 = vcmask 1041408  }
  0x13   :  { %115 = vmatprep.mubr.f32.mxu0 %v175_v0  ;;  %v26_v3 = vld [vmem:[#allocation2] sm:$0xff]  ;;  %v132_v4 = vpack.c.bf16 %v29_v2, %v27_v1  ;;  %v28_v5 = vld [vmem:[#allocation2 + $0x10] sm:$0xff]  ;;  %v31_v6 = vld [vmem:[#allocation2 + $0x28] sm:$0xff]  ;;  %vm40_vm1 = vcmask 408576  }
  0x14   :  { %v33_v7 = vld [vmem:[#allocation2 + $0x38] sm:$0xff]  ;;  %v134_v8 = vpack.c.bf16 %v28_v5, %v26_v3  ;;  %v30_v10 = vld [vmem:[#allocation2 + $0x20] sm:$0xff]  ;;  %v32_v11 = vld [vmem:[#allocation2 + $0x30] sm:$0xff] }
  0x15   :  { %v136_v9 = vpack.c.bf16 %v33_v7, %v31_v6  ;;  %v35_v12 = vld [vmem:[#allocation2 + $0x48] sm:$0xff]  ;;  %133 = vmatprep.subr.bf16.mxu0 %v132_v4  ;;  %v37_v13 = vld [vmem:[#allocation2 + $0x58] sm:$0xff]  ;;  %v138_v14 = vpack.c.bf16 %v32_v11, %v30_v10  ;;  %v34_v16 = vld [vmem:[#allocation2 + $0x40] sm:$0xff] }
  0x16   :  { %135 = vmatpush1.bf16.msra.mxu0 %v134_v8  ;;  %v140_v15 = vpack.c.bf16 %v37_v13, %v35_v12  ;;  %v36_v17 = vld [vmem:[#allocation2 + $0x50] sm:$0xff]  ;;  %v39_v19 = vld [vmem:[#allocation2 + $0x68] sm:$0x3]  ;;  %v38_v20 = vld [vmem:[#allocation2 + $0x60] sm:$0x3] }
  0x17   :  { %137 = vmatprep.subr.bf16.mxu0 %v136_v9  ;;  %v142_v18 = vpack.c.bf16 %v36_v17, %v34_v16  ;;  %v25_v21 = vld [vmem:[%s212_s0] sm:$0xff] }
  0x1a   :  { %139 = vmatpush1.bf16.msra.mxu0 %v138_v14 }
  0x1b   :  { %141 = vmatprep.subr.bf16.mxu0 %v140_v15 }
  0x1e   :  { %143 = vmatpush1.bf16.msra.mxu0 %v142_v18 }
  0x1f   :  { %129 = vmatprep.subr.msk.mxu0 %vm44_vm0, %v39_v19 }
  0x22   :  { %130 = vmatpush1.msk.msra.mxu0 %vm44_vm0, %v38_v20 }
  0x23   :  { %131 = vmatmul.mubr.msk.f32.vlgmr.msra.gmra.mrb[0].mxu0 %vm40_vm1, %v25_v21 }
  0xf6   :  { %v117_v22 = vpop.f32.mrb[0].mxu0 }
  0xf7   :  { %122 = vst [vmem:[%s214_s2] sm:$0xff] %v117_v22  ;;  %v119_v23 = vpop.f32.mrb[1].mxu0 }
  0xf8   :  { %123 = vst [vmem:[%s214_s2 + $0x8] sm:$0xff] %v119_v23 }
  0xf9   :  { %128 = vsyncpa [#allocation3], 1 }

</bundles_post_ra>
